<compile_context>
chip_gen: v7x
topology: tpu7x:2x2x1
jax: 0.10.0
libtpu: 0.0.40
codegen_flags: <defaults>
</compile_context>

<pallas_src>
import functools
import itertools

import jax
import jax.numpy as jnp
from jax.experimental import pallas as pl
from jax.experimental.pallas import tpu as pltpu


NUM_CORES = 2  # leading "parallel" grid axis: shards the N-reduction across
               # the 2 TensorCores of v7x; harmless (same total steps) on
               # single-TC v5e/v6e.


def _cdiv(a, b):
    return -(-a // b)


# ----------------------------- Pallas kernel ------------------------------- #

def _joint_kernel(logp_ref, gt_ref, paff_ref, gaff_ref,   # inputs
                  seg_ref, lm_ref,                          # outputs
                  acc_ref,                                  # VMEM scratch (B, TN) f32
                  *, num_classes, unroll_classes):
    """Fused NLL reduction (tiled over N, sharded over cores) + BCE cost matrix."""
    n = pl.program_id(1)
    last = pl.num_programs(1) - 1

    # ---- first step of this core: init accumulator + tiny BCE cost matrix ----
    @pl.when(n == 0)
    def _init_and_bce():
        acc_ref[...] = jnp.zeros_like(acc_ref)

        # (B, P, T) BCE matching-cost matrix on the VPU/EUP via broadcasting.
        # P/T/D are tiny, so the MXU (128^2/256^2 systolic array) would be
        # wasted and its warm-up would sit on the step-0 critical path.
        p = paff_ref[...].astype(jnp.float32)              # (B, P, D)
        g = gaff_ref[...].astype(jnp.float32)              # (B, T, D)
        d = p.shape[-1]
        # PyTorch binary_cross_entropy clamps log terms at -100 (covers p->0/1).
        log_p = jnp.maximum(jnp.log(p), -100.0)
        log_1mp = jnp.maximum(jnp.log(1.0 - p), -100.0)
        # lm[b,i,j] = mean_d BCE(p[b,i,d], g[b,j,d])
        bce = -(g[:, None, :, :] * log_p[:, :, None, :]
                + (1.0 - g[:, None, :, :]) * log_1mp[:, :, None, :])  # (B,P,T,D)
        lm_ref[...] = (jnp.sum(bce, axis=-1) * (1.0 / d)).reshape(lm_ref.shape)

    # ---- every step: gather -log p contributions into a VMEM vector ----
    # No cross-lane reduce and no SMEM scalar hop inside the N loop; the
    # accumulator lives in a (B, TN) f32 VMEM scratch.
    gt = gt_ref[...].astype(jnp.int32)                     # (B, TN)
    logp = logp_ref[...].astype(jnp.float32)               # (B, C, TN)
    if unroll_classes:
        # Purely elementwise VPU path (small static class count): compare/select/add.
        upd = jnp.where(gt == 0, logp[:, 0, :], 0.0)
        for c in range(1, num_classes):
            upd = upd + jnp.where(gt == c, logp[:, c, :], 0.0)
    else:
        # Large-C fallback: one-hot mask + class-axis reduce (still no full reduce).
        cls = jax.lax.broadcasted_iota(jnp.int32, logp.shape, 1)
        upd = jnp.sum(jnp.where(cls == gt[:, None, :], logp, 0.0), axis=1)
    # NOTE: class ids outside [0, C) silently contribute 0 (PyTorch raises).
    acc_ref[...] += upd                                    # (B, TN)

    # ---- last step of this core: single cross-lane reduce + store partial ----
    @pl.when(n == last)
    def _finalize():
        total = jnp.sum(acc_ref[...])
        seg_ref[...] = jnp.full(seg_ref.shape, total, jnp.float32)


# ------------------------------ sizing helpers ------------------------------ #

def _pick_vmem_limit_bytes():
    """Generation-aware VMEM budget: ~3/4 of physical, capped at 100 MiB.
    v5e/v6e (128 MiB physical) -> 96 MiB; v7x (64 MiB per TC) -> 48 MiB."""
    phys = 64 << 20  # conservative fallback (v7x-sized)
    try:
        phys = int(pltpu.get_tpu_info().vmem_capacity_bytes)
    except Exception:
        pass
    return max(32 << 20, min(phys * 3 // 4, 100 << 20))


def _choose_point_tiling(B, C, N, logp_itemsize, gt_itemsize,
                         resident_bytes, vmem_limit_bytes):
    """Pick the point tile TN (multiple of 128), per-core step count and padded
    point count so that the double-buffered (B, C, TN) log-prob tile, the
    (B, TN) gt tile and the (B, TN) f32 accumulator fill (but fit) VMEM."""
    per_point = (2 * B * C * logp_itemsize     # double-buffered log-prob tile
                 + 2 * B * gt_itemsize         # double-buffered class-id tile
                 + 4 * B)                      # f32 VMEM accumulator
    budget = vmem_limit_bytes - resident_bytes - (4 << 20)   # compiler headroom
    m_max = max(1, (budget // per_point) // 128)     # tile width in 128-lane blocks
    k = _cdiv(N, 128)                                # 128-point blocks total
    k_core = _cdiv(k, NUM_CORES)                     # blocks per core
    steps = _cdiv(k_core, m_max)                     # grid steps per core
    m = _cdiv(k_core, steps)                         # rebalance: minimal TN for that step count
    tn = m * 128
    n_pad = NUM_CORES * steps * tn
    return tn, steps, n_pad


# ------------------------------ JAX wrappers -------------------------------- #

def _min_assignment_cost(loss_matrix):
    """min_loss(): optimal-assignment cost summed over matches, averaged over B."""
    # TODO(synk): scipy.optimize.linear_sum_assignment has no Pallas/JAX
    # equivalent; exhaustive permutation search below is exact for square
    # cost matrices (pred_dim == target_dim) and small P (O(P!)).
    B, P, T = loss_matrix.shape
    assert P == T, "permutation-min substitute requires a square cost matrix"
    perms = jnp.array(list(itertools.permutations(range(P))), dtype=jnp.int32)
    rows = jnp.arange(P, dtype=jnp.int32)
    gathered = loss_matrix[:, rows[None, :], perms]        # (B, P!, P)
    per_perm = gathered.sum(axis=-1)                       # (B, P!)
    return per_perm.min(axis=-1).sum() / B


def pointnet_joint_loss(pred, target):
    logp = pred['segmentation_mask']                       # (B, C, N) log-probs
    gt = target['segmentation_mask']                       # (B, N) class ids
    if not jnp.issubdtype(gt.dtype, jnp.integer):
        gt = gt.astype(jnp.int32)                          # keep narrow int dtypes as-is
    paff = pred['affordance']                              # (B, P, D)
    gaff = target['affordance']                            # (B, T, D)

    B, C, N = logp.shape
    P = paff.shape[1]
    T = gaff.shape[1]

    vmem_limit = _pick_vmem_limit_bytes()
    resident = (paff.size * paff.dtype.itemsize
                + gaff.size * gaff.dtype.itemsize
                + 2 * (B * P * T + 8 * 128) * 4)           # small resident outputs
    TN, steps, n_pad = _choose_point_tiling(
        B, C, N, logp.dtype.itemsize, gt.dtype.itemsize, resident, vmem_limit)

    # Pad the points axis so every core sees `steps` full TN-wide tiles.
    # Padded log-probs are 0.0, so padded points contribute exactly 0 to the
    # NLL sum irrespective of the padded class id.
    if n_pad != N:
        logp = jnp.pad(logp, ((0, 0), (0, 0), (0, n_pad - N)))
        gt = jnp.pad(gt, ((0, 0), (0, n_pad - N)))

    kernel = functools.partial(_joint_kernel, num_classes=C,
                               unroll_classes=(C <= 32))

    seg_out, lm_out = pl.pallas_call(
        kernel,
        out_shape=(
            # per-core NLL partial sums (lane-dense block; wrapper reads [:,0,0])
            jax.ShapeDtypeStruct((NUM_CORES, 8, 128), jnp.float32),
            # per-core copy of the (B, P, T) BCE cost matrix (wrapper reads [0])
            jax.ShapeDtypeStruct((NUM_CORES, B, P, T), jnp.float32),
        ),
        grid_spec=pltpu.PrefetchScalarGridSpec(
            num_scalar_prefetch=0,
            grid=(NUM_CORES, steps),
            in_specs=[
                # log-probs: pipelined tiles over the points axis, split per core
                pl.BlockSpec((B, C, TN), lambda c, n: (0, 0, c * steps + n)),
                # 2-D int targets: tiled over the points axis
                pl.BlockSpec((B, TN), lambda c, n: (0, c * steps + n)),
                # affordance tensors: small, resident in VMEM (DMA'd once)
                pl.BlockSpec(memory_space=pltpu.VMEM),
                pl.BlockSpec(memory_space=pltpu.VMEM),
            ],
            out_specs=(
                pl.BlockSpec((1, 8, 128), lambda c, n: (c, 0, 0)),
                pl.BlockSpec((1, B, P, T), lambda c, n: (c, 0, 0, 0)),
            ),
            scratch_shapes=[pltpu.VMEM((B, TN), jnp.float32)],  # NLL vector accumulator
        ),
        compiler_params=pltpu.CompilerParams(
            dimension_semantics=("parallel", "arbitrary"),  # cores x N-reduction
            vmem_limit_bytes=vmem_limit),
    )(logp, gt, paff, gaff)

    seg_loss = -(seg_out[:, 0, 0].sum()) / (B * N)          # mean over original B*N
    aff_loss = _min_assignment_cost(lm_out[0])
    loss = aff_loss + 3.0 * seg_loss
    return {'seg_loss': seg_loss, 'aff_loss': aff_loss, 'loss': loss}


# ---------------------------------- main ------------------------------------ #

if __name__ == "__main__":
    B, C, N = 2, 4, 16        # batch, seg classes, points
    P = T = 4                 # affordance slots (pred / target)
    D = 8                     # affordance feature dim

    key = jax.random.PRNGKey(0)
    k1, k2, k3, k4 = jax.random.split(key, 4)

    logits = jax.random.normal(k1, (B, C, N), dtype=jnp.float32)
    pred_seg = jax.nn.log_softmax(logits, axis=1)                    # log-probs
    gt_seg = jax.random.randint(k2, (B, N), 0, C, dtype=jnp.int32)   # class ids
    pred_aff = jax.nn.sigmoid(jax.random.normal(k3, (B, P, D), jnp.float32))
    gt_aff = jax.random.bernoulli(k4, 0.5, (B, T, D)).astype(jnp.float32)

    pred = {'segmentation_mask': pred_seg, 'affordance': pred_aff}
    target = {'segmentation_mask': gt_seg, 'affordance': gt_aff}

    out = pointnet_joint_loss(pred, target)
    out = jax.tree_util.tree_map(jax.block_until_ready, out)

    # Pure-JAX reference check of the fused Pallas hot paths.
    onehot = jax.nn.one_hot(gt_seg, C, axis=1)
    seg_ref_val = -(pred_seg * onehot).sum() / (B * N)
    p4 = pred_aff[:, :, None, :]
    g4 = gt_aff[:, None, :, :]
    bce = -(g4 * jnp.maximum(jnp.log(p4), -100.0)
            + (1.0 - g4) * jnp.maximum(jnp.log(1.0 - p4), -100.0))
    aff_ref_val = _min_assignment_cost(bce.mean(axis=-1))
    loss_ref_val = aff_ref_val + 3.0 * seg_ref_val

    assert jnp.allclose(out['seg_loss'], seg_ref_val, atol=1e-4), \
        (out['seg_loss'], seg_ref_val)
    assert jnp.allclose(out['aff_loss'], aff_ref_val, atol=1e-4), \
        (out['aff_loss'], aff_ref_val)
    assert jnp.allclose(out['loss'], loss_ref_val, atol=1e-4), \
        (out['loss'], loss_ref_val)

    print("KERNEL_OK")
</pallas_src>

<mosaic_0001>
module attributes {stable_mosaic.version = 11 : i64} {
  func.func @_joint_kernel(%arg0: i32, %arg1: i32, %arg2: memref<2x4x128xf32, #tpu.memory_space<vmem>>, %arg3: memref<2x128xi32, #tpu.memory_space<vmem>>, %arg4: memref<2x4x8xf32, #tpu.memory_space<vmem>>, %arg5: memref<2x4x8xf32, #tpu.memory_space<vmem>>, %arg6: memref<1x8x128xf32, #tpu.memory_space<vmem>>, %arg7: memref<1x2x4x4xf32, #tpu.memory_space<vmem>>, %arg8: memref<2x128xf32, #tpu.memory_space<vmem>>) attributes {dimension_semantics = [#tpu.dimension_semantics<parallel>, #tpu.dimension_semantics<arbitrary>], iteration_bounds = array<i64: 2, 1>, scalar_prefetch = 0 : i64, scratch_operands = 1 : i64, tpu.core_type = #tpu.core_type<tc>, window_params = [{transform_indices = @transform_0, window_bounds = array<i64: 2, 4, 128>}, {transform_indices = @transform_1, window_bounds = array<i64: 2, 128>}, {pipeline_mode = #tpu.pipeline_mode<synchronous>, transform_indices = @transform_2, window_bounds = array<i64: 2, 4, 8>}, {pipeline_mode = #tpu.pipeline_mode<synchronous>, transform_indices = @transform_3, window_bounds = array<i64: 2, 4, 8>}, {transform_indices = @transform_4, window_bounds = array<i64: 1, 8, 128>}, {transform_indices = @transform_5, window_bounds = array<i64: 1, 2, 4, 4>}]} {
    %c0_i32 = arith.constant 0 : i32
    %0 = arith.cmpi eq, %arg1, %c0_i32 : i32
    %1 = arith.extui %0 : i1 to i32
    %c0_i32_0 = arith.constant 0 : i32
    %2 = arith.cmpi ne, %1, %c0_i32_0 : i32
    scf.if %2 {
      %cst_15 = arith.constant 0.000000e+00 : f32
      %38 = vector.broadcast %cst_15 : f32 to vector<2x128xf32>
      %c0_16 = arith.constant 0 : index
      %c0_17 = arith.constant 0 : index
      %39 = vector.load %arg8[%c0_16, %c0_17] : memref<2x128xf32, #tpu.memory_space<vmem>>, vector<2x128xf32>
      tpu.vector_store %arg8[%c0_16, %c0_17], %38 {strides = array<i32>} : memref<2x128xf32, #tpu.memory_space<vmem>>, vector<2x128xf32>,
      %c0_18 = arith.constant 0 : index
      %c0_19 = arith.constant 0 : index
      %c0_20 = arith.constant 0 : index
      %40 = vector.load %arg4[%c0_18, %c0_19, %c0_20] : memref<2x4x8xf32, #tpu.memory_space<vmem>>, vector<2x4x8xf32>
      %c0_21 = arith.constant 0 : index
      %c0_22 = arith.constant 0 : index
      %c0_23 = arith.constant 0 : index
      %41 = vector.load %arg5[%c0_21, %c0_22, %c0_23] : memref<2x4x8xf32, #tpu.memory_space<vmem>>, vector<2x4x8xf32>
      %42 = math.log %40 : vector<2x4x8xf32>
      %cst_24 = arith.constant -1.000000e+02 : f32
      %43 = vector.broadcast %cst_24 : f32 to vector<2x4x8xf32>
      %44 = arith.maximumf %42, %43 : vector<2x4x8xf32>
      %cst_25 = arith.constant 1.000000e+00 : f32
      %45 = vector.broadcast %cst_25 : f32 to vector<2x4x8xf32>
      %46 = arith.subf %45, %40 : vector<2x4x8xf32>
      %47 = math.log %46 : vector<2x4x8xf32>
      %cst_26 = arith.constant -1.000000e+02 : f32
      %48 = vector.broadcast %cst_26 : f32 to vector<2x4x8xf32>
      %49 = arith.maximumf %47, %48 : vector<2x4x8xf32>
      %50 = vector.shape_cast %41 : vector<2x4x8xf32> to vector<2x1x4x8xf32>
      %51 = vector.shape_cast %44 : vector<2x4x8xf32> to vector<2x4x1x8xf32>
      %52 = vector.broadcast %50 : vector<2x1x4x8xf32> to vector<2x4x4x8xf32>
      %53 = vector.broadcast %51 : vector<2x4x1x8xf32> to vector<2x4x4x8xf32>
      %54 = arith.mulf %52, %53 : vector<2x4x4x8xf32>
      %55 = vector.shape_cast %41 : vector<2x4x8xf32> to vector<2x1x4x8xf32>
      %cst_27 = arith.constant 1.000000e+00 : f32
      %56 = vector.broadcast %cst_27 : f32 to vector<2x1x4x8xf32>
      %57 = arith.subf %56, %55 : vector<2x1x4x8xf32>
      %58 = vector.shape_cast %49 : vector<2x4x8xf32> to vector<2x4x1x8xf32>
      %59 = vector.broadcast %57 : vector<2x1x4x8xf32> to vector<2x4x4x8xf32>
      %60 = vector.broadcast %58 : vector<2x4x1x8xf32> to vector<2x4x4x8xf32>
      %61 = arith.mulf %59, %60 : vector<2x4x4x8xf32>
      %62 = arith.addf %54, %61 : vector<2x4x4x8xf32>
      %cst_28 = arith.constant 0.000000e+00 : f32
      %63 = vector.broadcast %cst_28 : f32 to vector<2x4x4x8xf32>
      %64 = arith.subf %63, %62 : vector<2x4x4x8xf32>
      %cst_29 = arith.constant dense<0.000000e+00> : vector<2x4x4xf32>
      %65 = vector.multi_reduction <add>, %64, %cst_29 [3] : vector<2x4x4x8xf32> to vector<2x4x4xf32>
      %cst_30 = arith.constant 1.250000e-01 : f32
      %66 = vector.broadcast %cst_30 : f32 to vector<2x4x4xf32>
      %67 = arith.mulf %65, %66 : vector<2x4x4xf32>
      %68 = vector.shape_cast %67 : vector<2x4x4xf32> to vector<1x2x4x4xf32>
      %c0_31 = arith.constant 0 : index
      %c0_32 = arith.constant 0 : index
      %c0_33 = arith.constant 0 : index
      %c0_34 = arith.constant 0 : index
      %69 = vector.load %arg7[%c0_31, %c0_32, %c0_33, %c0_34] : memref<1x2x4x4xf32, #tpu.memory_space<vmem>>, vector<1x2x4x4xf32>
      tpu.vector_store %arg7[%c0_31, %c0_32, %c0_33, %c0_34], %68 {strides = array<i32>} : memref<1x2x4x4xf32, #tpu.memory_space<vmem>>, vector<1x2x4x4xf32>,
    } else {
    }
    %c0 = arith.constant 0 : index
    %c0_1 = arith.constant 0 : index
    %3 = vector.load %arg3[%c0, %c0_1] : memref<2x128xi32, #tpu.memory_space<vmem>>, vector<2x128xi32>
    %c0_2 = arith.constant 0 : index
    %c0_3 = arith.constant 0 : index
    %c0_4 = arith.constant 0 : index
    %4 = vector.load %arg2[%c0_2, %c0_3, %c0_4] : memref<2x4x128xf32, #tpu.memory_space<vmem>>, vector<2x4x128xf32>
    %c0_i32_5 = arith.constant 0 : i32
    %5 = vector.broadcast %c0_i32_5 : i32 to vector<2x128xi32>
    %6 = arith.cmpi eq, %3, %5 : vector<2x128xi32>
    %7 = vector.extract_strided_slice %4 {offsets = [0, 0, 0], sizes = [2, 1, 128], strides = [1, 1, 1]} : vector<2x4x128xf32> to vector<2x1x128xf32>
    %8 = vector.shape_cast %7 : vector<2x1x128xf32> to vector<2x128xf32>
    %cst = arith.constant 0.000000e+00 : f32
    %9 = vector.broadcast %cst : f32 to vector<2x128xf32>
    %10 = arith.select %6, %8, %9 : vector<2x128xi1>, vector<2x128xf32>
    %c1_i32 = arith.constant 1 : i32
    %11 = vector.broadcast %c1_i32 : i32 to vector<2x128xi32>
    %12 = arith.cmpi eq, %3, %11 : vector<2x128xi32>
    %13 = vector.extract_strided_slice %4 {offsets = [0, 1, 0], sizes = [2, 1, 128], strides = [1, 1, 1]} : vector<2x4x128xf32> to vector<2x1x128xf32>
    %14 = vector.shape_cast %13 : vector<2x1x128xf32> to vector<2x128xf32>
    %cst_6 = arith.constant 0.000000e+00 : f32
    %15 = vector.broadcast %cst_6 : f32 to vector<2x128xf32>
    %16 = arith.select %12, %14, %15 : vector<2x128xi1>, vector<2x128xf32>
    %17 = arith.addf %10, %16 : vector<2x128xf32>
    %c2_i32 = arith.constant 2 : i32
    %18 = vector.broadcast %c2_i32 : i32 to vector<2x128xi32>
    %19 = arith.cmpi eq, %3, %18 : vector<2x128xi32>
    %20 = vector.extract_strided_slice %4 {offsets = [0, 2, 0], sizes = [2, 1, 128], strides = [1, 1, 1]} : vector<2x4x128xf32> to vector<2x1x128xf32>
    %21 = vector.shape_cast %20 : vector<2x1x128xf32> to vector<2x128xf32>
    %cst_7 = arith.constant 0.000000e+00 : f32
    %22 = vector.broadcast %cst_7 : f32 to vector<2x128xf32>
    %23 = arith.select %19, %21, %22 : vector<2x128xi1>, vector<2x128xf32>
    %24 = arith.addf %17, %23 : vector<2x128xf32>
    %c3_i32 = arith.constant 3 : i32
    %25 = vector.broadcast %c3_i32 : i32 to vector<2x128xi32>
    %26 = arith.cmpi eq, %3, %25 : vector<2x128xi32>
    %27 = vector.extract_strided_slice %4 {offsets = [0, 3, 0], sizes = [2, 1, 128], strides = [1, 1, 1]} : vector<2x4x128xf32> to vector<2x1x128xf32>
    %28 = vector.shape_cast %27 : vector<2x1x128xf32> to vector<2x128xf32>
    %cst_8 = arith.constant 0.000000e+00 : f32
    %29 = vector.broadcast %cst_8 : f32 to vector<2x128xf32>
    %30 = arith.select %26, %28, %29 : vector<2x128xi1>, vector<2x128xf32>
    %31 = arith.addf %24, %30 : vector<2x128xf32>
    %c0_9 = arith.constant 0 : index
    %c0_10 = arith.constant 0 : index
    %32 = vector.load %arg8[%c0_9, %c0_10] : memref<2x128xf32, #tpu.memory_space<vmem>>, vector<2x128xf32>
    %33 = arith.addf %32, %31 : vector<2x128xf32>
    %c0_11 = arith.constant 0 : index
    %c0_12 = arith.constant 0 : index
    %34 = vector.load %arg8[%c0_11, %c0_12] : memref<2x128xf32, #tpu.memory_space<vmem>>, vector<2x128xf32>
    tpu.vector_store %arg8[%c0_11, %c0_12], %33 {strides = array<i32>} : memref<2x128xf32, #tpu.memory_space<vmem>>, vector<2x128xf32>,
    %c0_i32_13 = arith.constant 0 : i32
    %35 = arith.cmpi eq, %arg1, %c0_i32_13 : i32
    %36 = arith.extui %35 : i1 to i32
    %c0_i32_14 = arith.constant 0 : i32
    %37 = arith.cmpi ne, %36, %c0_i32_14 : i32
    scf.if %37 {
      %c0_15 = arith.constant 0 : index
      %c0_16 = arith.constant 0 : index
      %38 = vector.load %arg8[%c0_15, %c0_16] : memref<2x128xf32, #tpu.memory_space<vmem>>, vector<2x128xf32>
      %39 = vector.shape_cast %38 : vector<2x128xf32> to vector<1x2x128xf32>
      %cst_17 = arith.constant dense<0.000000e+00> : vector<1xf32>
      %40 = vector.multi_reduction <add>, %39, %cst_17 [1, 2] : vector<1x2x128xf32> to vector<1xf32>
      %41 = vector.shape_cast %40 : vector<1xf32> to vector<1x1x1xf32>
      %42 = vector.extract %41[0, 0, 0] : f32 from vector<1x1x1xf32>
      %43 = vector.broadcast %42 : f32 to vector<1x8x128xf32>
      %c0_18 = arith.constant 0 : index
      %c0_19 = arith.constant 0 : index
      %c0_20 = arith.constant 0 : index
      %44 = vector.load %arg6[%c0_18, %c0_19, %c0_20] : memref<1x8x128xf32, #tpu.memory_space<vmem>>, vector<1x8x128xf32>
      tpu.vector_store %arg6[%c0_18, %c0_19, %c0_20], %43 {strides = array<i32>} : memref<1x8x128xf32, #tpu.memory_space<vmem>>, vector<1x8x128xf32>,
    } else {
    }
    return
  }
  func.func @transform_0(%arg0: i32, %arg1: i32) -> (i32, i32, i32) {
    %c1_i32 = arith.constant 1 : i32
    %0 = arith.muli %arg0, %c1_i32 : i32
    %1 = arith.addi %0, %arg1 : i32
    %c0_i32 = arith.constant 0 : i32
    %c0_i32_0 = arith.constant 0 : i32
    %c0_i32_1 = arith.constant 0 : i32
    return %c0_i32, %c0_i32_0, %1 : i32, i32, i32
  }
  func.func @transform_1(%arg0: i32, %arg1: i32) -> (i32, i32) {
    %c1_i32 = arith.constant 1 : i32
    %0 = arith.muli %arg0, %c1_i32 : i32
    %1 = arith.addi %0, %arg1 : i32
    %c0_i32 = arith.constant 0 : i32
    %c0_i32_0 = arith.constant 0 : i32
    return %c0_i32, %1 : i32, i32
  }
  func.func @transform_2(%arg0: i32, %arg1: i32) -> (i32, i32, i32) {
    %c0_i32 = arith.constant 0 : i32
    %c0_i32_0 = arith.constant 0 : i32
    %c0_i32_1 = arith.constant 0 : i32
    %c0_i32_2 = arith.constant 0 : i32
    return %c0_i32, %c0_i32_0, %c0_i32_1 : i32, i32, i32
  }
  func.func @transform_3(%arg0: i32, %arg1: i32) -> (i32, i32, i32) {
    %c0_i32 = arith.constant 0 : i32
    %c0_i32_0 = arith.constant 0 : i32
    %c0_i32_1 = arith.constant 0 : i32
    %c0_i32_2 = arith.constant 0 : i32
    return %c0_i32, %c0_i32_0, %c0_i32_1 : i32, i32, i32
  }
  func.func @transform_4(%arg0: i32, %arg1: i32) -> (i32, i32, i32) {
    %c0_i32 = arith.constant 0 : i32
    %c0_i32_0 = arith.constant 0 : i32
    %c0_i32_1 = arith.constant 0 : i32
    return %arg0, %c0_i32, %c0_i32_0 : i32, i32, i32
  }
  func.func @transform_5(%arg0: i32, %arg1: i32) -> (i32, i32, i32, i32) {
    %c0_i32 = arith.constant 0 : i32
    %c0_i32_0 = arith.constant 0 : i32
    %c0_i32_1 = arith.constant 0 : i32
    %c0_i32_2 = arith.constant 0 : i32
    return %arg0, %c0_i32, %c0_i32_0, %c0_i32_1 : i32, i32, i32, i32
  }
}

</mosaic_0001>

<bundles_post_ra>
// kernel: tpu_custom_call.1
= control target key start
LH: loop header
LB: loop body
LE: loop exit
PB: predicated region body
PF: predicated region fallthrough
CT: control target
= control target key end

     0   :  { %s1635_s0 = inlined_call_operand.hbm [shape: f32[2,4,256], index: 0, kind: input, shape index: {}]   ;;  %s1636_s1 = inlined_call_operand.hbm [shape: s32[2,256], index: 1, kind: input, shape index: {}]   ;;  %s1637_s2 = inlined_call_operand.hbm [shape: f32[2,4,8], index: 2, kind: input, shape index: {}]   ;;  %s1638_s3 = inlined_call_operand.vmem [shape: f32[2,4,8], index: 3, kind: input, shape index: {}]   ;;  %s1639_s4 = inlined_call_operand.hbm [shape: f32[2,8,128], index: 4, kind: output, shape index: {0}]   ;;  %s1640_s5 = inlined_call_operand.hbm [shape: f32[2,2,4,4], index: 5, kind: output, shape index: {1}]  }
   0x1   :  { %1651 = sst [smem:[#allocation21_spill]] %s1635_s0 }
   0x2   :  { %1652 = sst [smem:[#allocation22_spill]] %s1637_s2 }
   0x3   :  { %11 = vsyncpa [#allocation4], 0 }
   0x4   :  { %13 = vsyncpa [#allocation4 + $0x1], 0 }
   0x5   :  { %14 = vsyncpa [#allocation7], 0 }
   0x6   :  { %16 = vsyncpa [#allocation7 + $0x1], 0 }
   0x7   :  { %17 = vsyncpa [#allocation5], 0 }
   0x8   :  { %19 = vsyncpa [#allocation5 + $0x1], 0 }
   0x9   :  { %20 = vsyncpa [#allocation11], 0 }
   0xa   :  { %22 = vsyncpa [#allocation11 + $0x1], 0  ;;  %s1257_s18 = smov 0   ;;  %s1259_s19 = smov 0  }
   0xb   :  { %s1261_s20 = smov 0   ;;  %s1263_s21 = smov 0  }
   0xc   :  { %s1265_s22 = smov 0   ;;  %s1267_s23 = smov 0  }
   0xd LB: > { %1653 = sst [smem:[#allocation17_spill]] %s1201_s20  ;;  %s1288_s24 = sadd.s32 4294967295, %s1213_s23   ;;  %s1213_s23 = sphi %s1267_s23, %s28_s23   ;;  %s1209_s22 = sphi %s1265_s22, %s1686_s22   ;;  %s1205_s21 = sphi %s1263_s21, %s1685_s21   ;;  %s1201_s20 = sphi %s1261_s20, %s1681_s20   ;;  %s1197_s19 = sphi %s1259_s19, %s1684_s19   ;;  %s1193_s18 = sphi %s1257_s18, %s1683_s18  }
   0xe   : > { %s881_s25 = sadd.s32 4294967294, %s1213_s23   ;;  %p56_p0 = scmp.ne.s32.totalorder %s1201_s20, %s1197_s19 }
   0xf   : > { %p57_p1 = scmp.eq.s32.totalorder %s1213_s23, 0  ;;  %p62_p2 = scmp.ne.s32.totalorder %s1197_s19, %s1193_s18 }
  0x10   : > { %p1641_p3 = scmp.eq.s32.totalorder %s1288_s24, 0  ;;  %p156_p4 = scmp.eq.s32.totalorder %s1288_s24, 1 }
  0x11   : > { %p1299_p5 = por %p57_p1, %p56_p0  ;;  %p162_p6 = scmp.eq.s32.totalorder %s881_s25, 1 }
  0x12   : > { %p1305_p7 = por %p1641_p3, %p62_p2  ;;  %p1309_p8 = por %p156_p4, %p56_p0 }
  0x13   : > { %p1313_p9 = por %p162_p6, %p62_p2  ;;  %p882_p10 = scmp.ge.s32.totalorder %s1213_s23, 1 }
  0x14   : > { %s1655_s28 = scalar_select %p1305_p7, 1, 0 }
  0x15   : > { %s1656_s29 = scalar_select %p1309_p8, 1, 0 }
  0x16   : > { %s1657_s30 = scalar_select %p1313_p9, 1, 0 }
  0x17   : > { %p195_p11 = scmp.lt.s32.totalorder %s1213_s23, 3  ;;  %s1215_s7 = smov [#allocation8]  }
  0x18   : > { %1658 = sst [smem:[#allocation18_spill]] %s1657_s30  ;;  %s207_s8 = sshll.u32 %s1215_s7, 4  ;;  %s1323_s8 = int_to_ptr.vmem [resolvable:$true] %s207_s8 }
  0x19   : > { %p1319_p12 = pnand %p882_p10, %p195_p11  ;;  %p936_p1 = scmp.lt.s32.totalorder %s1213_s23, 2 }
  0x1a   : > { %s40_s11 = sadd.s32 1, %s1209_s22  ;;  %s1663_s2 = sld [smem:[#allocation22_spill]] }
  0x1b   : > { %s1659_s6 = scalar_select %p1319_p12, 1, 0 }
  0x1c   : > { %p917_p13 = pneg %p1319_p12  ;;  %p1337_p4 = pnand %p936_p1, %p1299_p5 }
  0x1d   : > { %p1342_p6 = scmp.ge.s32.totalorder %s40_s11, 2 }
  0x1e   : > { %p1331_p2 = pnand %p917_p13, %p1641_p3 }
  0x1f   : > { %s1661_s10 = scalar_select %p1337_p4, 1, 0 }
  0x20   : > { %s1662_s12 = scalar_select %p1342_p6, 1, 0 }
  0x21   : > { %s1003_s15 = scalar_lea.hbm %s1663_s2, 128  ;;  %p1005_p11 = pneg %p1331_p2 }
  0x22   : > { %p1004_p10 = scmp.ne.s32.totalorder %s1663_s2, %s1003_s15  ;;  %p1010_p1 = scmp.lt.u32.totalorder %s1003_s15, %s1663_s2 }
  0x24   : > { %p1006_p13 = pnand %p1005_p11, %p1004_p10 }
  0x26   : > { %p1007_p5 = pneg %p1006_p13 }
  0x28   : > { %p1012_p0 = pnand %p1010_p1, %p1007_p5 }
  0x2a   : > { %1015 = shalt.err (!%p1012_p0)
}
  0x2b   : > { %s1016_s7 = scalar_lea.vmem %s1323_s8, 128  ;;  %p1024_p7 = scmp.lt.s32.totalorder %s1323_s8, %s1323_s8 }
  0x2c   : > { %p1017_p3 = scmp.ne.s32.totalorder %s1323_s8, %s1016_s7  ;;  %p1025_p12 = scmp.lt.s32.totalorder %s1016_s7, %s1016_s7 }
  0x2e   : > { %p1019_p9 = pnand %p1017_p3, %p1005_p11  ;;  %p1026_p4 = por %p1025_p12, %p1024_p7 }
  0x30   : > { %p1020_p8 = pneg %p1019_p9 }
  0x32   : > { %p1027_p6 = pnand %p1026_p4, %p1020_p8 }
  0x34   : > { %1030 = shalt.err (!%p1027_p6)
}
  0x35   : > { %s1647_s13 = smov 64   ;;  %s1648_s14 = smov 4  }
  0x36   : > { %920 = dma.hbm_to_vmem [thread:$0]  (!%p1331_p2), %s1663_s2, 128, %s1323_s8, [#allocation7], %s1647_s13, %s1647_s13, %s1648_s14  }
  0x37   : > { %s1371_s17 = sand.u32 1, %s1201_s20   ;;  %p1664_p3 = scmp.ne.s32.totalorder %s1662_s12, 0 }
  0x38   : > { %s885_s25 = sshll.u32 %s1371_s17, 3  ;;  %s886_s9 = sshll.u32 %s1209_s22, 6 }
  0x39   : > { %s1688_s11 = smov (%p1664_p3, %s40_s11), 0  ;;  %s1666_s0 = sld [smem:[#allocation21_spill]] }
  0x3a   : > { %1665 = sst [smem:[#allocation19_spill]] %s1688_s11  ;;  %s46_s27 = ssub.s32 %s1209_s22, %s1688_s11 }
  0x3b   : > { %p47_p7 = scmp.eq.s32.totalorder %s46_s27, 0  ;;  %s228_s8 = scalar_lea.vmem [#allocation3], %s885_s25 }
  0x3c   : > { %s235_s12 = sshll.u32 %s228_s8, 4  ;;  %s1667_s15 = sadd.s32 1, %s1201_s20  ;;  %s1391_s12 = int_to_ptr.vmem [resolvable:$true] %s235_s12 }
  0x3d   : > { %s1389_s16 = scalar_select %p47_p7, %s1201_s20, %s1667_s15  }
  0x3e   : > { %s225_s13 = scalar_lea.sflag [#allocation4], %s1371_s17  ;;  %p1669_p9 = scmp.ne.s32.totalorder %s1661_s10, 0 }
  0x3f   : > { %s1384_s30 = scalar_lea.hbm %s1666_s0, %s886_s9  ;;  %1668 = sst [smem:[#allocation20_spill]] %s1389_s16 }
  0x40   : > { %s1031_s14 = scalar_lea.hbm %s1384_s30, 128  ;;  %p1033_p12 = pneg %p1669_p9 }
  0x41   : > { %p1032_p8 = scmp.ne.s32.totalorder %s1384_s30, %s1031_s14  ;;  %s1036_s9 = scalar_lea.hbm %s1666_s0, 256 }
  0x42   : > { %p1037_p4 = scmp.lt.u32.totalorder %s1384_s30, %s1666_s0  ;;  %p1038_p6 = scmp.lt.u32.totalorder %s1036_s9, %s1031_s14 }
  0x43   : > { %p1034_p0 = pnand %p1033_p12, %p1032_p8  ;;  %p1040_p11 = scmp.lt.u32.totalorder %s1031_s14, %s1384_s30 }
  0x44   : > { %p1039_p10 = por %p1038_p6, %p1037_p4 }
  0x45   : > { %p1035_p2 = pneg %p1034_p0 }
  0x46   : > { %p1041_p13 = por %p1040_p11, %p1039_p10 }
  0x48   : > { %p1042_p5 = pnand %p1041_p13, %p1035_p2 }
  0x4a   : > { %1045 = shalt.err (!%p1042_p5)
}
  0x4b   : > { %s1046_s8 = scalar_lea.vmem %s1391_s12, 128  ;;  %s1218_s15 = smov [#allocation3]  }
  0x4c   : > { %p1047_p1 = scmp.ne.s32.totalorder %s1391_s12, %s1046_s8  ;;  %s1051_s26 = sshll.u32 %s1218_s15, 4  ;;  %s1052_s26 = int_to_ptr.vmem [resolvable:$false] %s1051_s26 }
  0x4d   : > { %s1053_s27 = scalar_lea.vmem %s1052_s26, 256  ;;  %p1054_p8 = scmp.lt.s32.totalorder %s1391_s12, %s1052_s26 }
  0x4e   : > { %p1049_p3 = pnand %p1047_p1, %p1033_p12  ;;  %p1055_p0 = scmp.lt.s32.totalorder %s1053_s27, %s1046_s8 }
  0x50   : > { %p1050_p7 = pneg %p1049_p3  ;;  %p1056_p4 = por %p1055_p0, %p1054_p8 }
  0x52   : > { %p1057_p6 = pnand %p1056_p4, %p1050_p7 }
  0x54   : > { %1060 = shalt.err (!%p1057_p6)
}
  0x55   : > { %s1219_s14 = smov 128   ;;  %s1670_s9 = smov 4  }
  0x56   : > { %s1671_s25 = smov 64   ;;  %s245_s7 = sand.u32 1, %s1213_s23  }
  0x57   : > { %924 = dma.hbm_to_vmem [thread:$0]  (!%p1669_p9), %s1384_s30, 128, %s1391_s12, %s225_s13, %s1219_s14, %s1671_s25, %s1670_s9  }
  0x58   : > { %s887_s15 = sshll.u32 %s1371_s17, 1  ;;  %s888_s8 = sshll.u32 %s1209_s22, 5 }
  0x59   : > { %s249_s26 = scalar_lea.vmem [#allocation6], %s887_s15  ;;  %s1429_s11 = scalar_lea.hbm %s1636_s1, %s888_s8 }
  0x5a   : > { %s257_s27 = sshll.u32 %s249_s26, 4  ;;  %s246_s16 = scalar_lea.sflag [#allocation7], %s245_s7  ;;  %s258_s27 = int_to_ptr.vmem [resolvable:$true] %s257_s27 }
  0x5b   : > { %s1061_s20 = scalar_lea.hbm %s1429_s11, 32  ;;  %s1066_s17 = scalar_lea.hbm %s1636_s1, 64 }
  0x5c   : > { %p1062_p2 = scmp.ne.s32.totalorder %s1429_s11, %s1061_s20  ;;  %p1067_p13 = scmp.lt.u32.totalorder %s1429_s11, %s1636_s1 }
  0x5d   : > { %p1068_p5 = scmp.lt.u32.totalorder %s1066_s17, %s1061_s20  ;;  %p1070_p3 = scmp.lt.u32.totalorder %s1061_s20, %s1429_s11 }
  0x5e   : > { %p1064_p10 = pnand %p1062_p2, %p1033_p12 }
  0x5f   : > { %p1069_p1 = por %p1068_p5, %p1067_p13 }
  0x60   : > { %p1065_p11 = pneg %p1064_p10 }
  0x61   : > { %p1071_p7 = por %p1070_p3, %p1069_p1 }
  0x63   : > { %p1072_p8 = pnand %p1071_p7, %p1065_p11 }
  0x65   : > { %1075 = shalt.err (!%p1072_p8)
}
  0x66   : > { %s1076_s2 = scalar_lea.vmem %s258_s27, 32  ;;  %s1220_s14 = smov [#allocation6]  }
  0x67   : > { %p1077_p0 = scmp.ne.s32.totalorder %s258_s27, %s1076_s2  ;;  %s1081_s9 = sshll.u32 %s1220_s14, 4  ;;  %s1082_s9 = int_to_ptr.vmem [resolvable:$false] %s1081_s9 }
  0x68   : > { %s1083_s25 = scalar_lea.vmem %s1082_s9, 64  ;;  %p1084_p2 = scmp.lt.s32.totalorder %s258_s27, %s1082_s9 }
  0x69   : > { %p1079_p4 = pnand %p1077_p0, %p1033_p12  ;;  %p1085_p10 = scmp.lt.s32.totalorder %s1083_s25, %s1076_s2 }
  0x6b   : > { %p1080_p6 = pneg %p1079_p4  ;;  %p1086_p5 = por %p1085_p10, %p1084_p2 }
  0x6d   : > { %p1087_p13 = pnand %p1086_p5, %p1080_p6 }
  0x6f   : > { %1090 = shalt.err (!%p1087_p13)
}
  0x70   : > { %927 = dma.hbm_to_vmem [thread:$0]  (!%p1669_p9), %s1429_s11, 32, %s258_s27, %s246_s16  }
  0x71   : > { %p1672_p11 = scmp.ne.s32.totalorder %s1659_s6, 0 }
  0x72   : > { %s1453_s20 = sand.u32 (!%p1672_p11), 1, %s1197_s19   ;;  %p1673_p12 = scmp.ne.s32.totalorder (!%p1672_p11), %s1655_s28, 0 }
  0x73   : > { %266 = sbr.rel (%p1672_p11) target bundleno = 371 (0x173), region = 36  ;;  %s1456_s7 = sshll.u32 (!%p1672_p11), %s1453_s20, 3 }
  0x74   : > { %s269_s15 = scalar_lea.sflag (!%p1672_p11), [#allocation4], %s1453_s20  ;;  %s272_s8 = scalar_lea.vmem (!%p1672_p11), [#allocation3], %s1456_s7 }
  0x7a   : > { %1172 = dma.done.wait (%p1673_p12), %s269_s15, 128  }
  0x7b   : > { %1174 = vsyncadd (%p1673_p12), %s269_s15, 4294967168  ;;  %s277_s6 = sand.u32 1, %s1288_s24   ;;  %s891_s10 = sshll.u32 %s1453_s20, 1 }
  0x7c   : > { %s278_s11 = scalar_lea.sflag [#allocation7], %s277_s6  ;;  %s281_s16 = scalar_lea.vmem [#allocation6], %s891_s10 }
  0x7d   : > { %1176 = dma.done.wait (%p1673_p12), %s278_s11, 32  }
  0x7e   : > { %1178 = vsyncadd (%p1673_p12), %s278_s11, 4294967264  ;;  %p1674_p9 = scmp.eq.s32.totalorder %s1288_s24, 0 }
  0x80   : > { %1180 = dma.done.wait (%p1674_p9), [#allocation7], 128   ;;  %p1675_p1 = pmov %p1674_p9 }
  0x81   : > { %v1221_v0 = vmov 0.0   ;;  %vm636_vm0 = vcmask 1041409   ;;  %v650_v1 = vld [vmem:[%s281_s16] sm:$0x3]  ;;  %v651_v2 = vld [vmem:[%s272_s8] sm:$0xf]  ;;  %v352_v26 = vlaneseq }
  0x82   : > { %1182 = vsyncadd (%p1675_p1), [#allocation7], 4294967168  ;;  %328 = vst [vmem:[#allocation2] sm:$0x3] %v1221_v0  ;;  %v652_v3 = vld [vmem:[%s272_s8 + $0x4] sm:$0xf] }
  0x83   : > { %vm653_vm1 = vcmp.eq.s32.totalorder %v650_v1, 0  ;;  %v656_v4 = vrot.slane %v652_v3, 7  ;;  %vm661_vm2 = vcmp.eq.s32.totalorder %v650_v1, 1  ;;  %v662_v5 = vrot.slane %v651_v2, 1  ;;  %v330_v8 = vld [vmem:[#allocation8 + $0x4] sm:$0xf] }
  0x84   : > { %vm667_vm3 = vcmp.eq.s32.totalorder %v650_v1, 2  ;;  %v668_v6 = vrot.slane %v651_v2, 2  ;;  %v669_v7 = vrot.slane %v652_v3, 1  ;;  %vm674_vm4 = vcmp.eq.s32.totalorder %v650_v1, 3  ;;  %v329_v13 = vld [vmem:[#allocation8] sm:$0xf] }
  0x85   : > { %v658_v9 = vsel %vm636_vm0, %v656_v4, %v651_v2  ;;  %v663_v10 = vsel %vm636_vm0, %v652_v3, %v662_v5  ;;  %v675_v11 = vrot.slane %v651_v2, 3  ;;  %v676_v12 = vrot.slane %v652_v3, 2  ;;  %v1485_v40 = vld [vmem:[%s1638_s3 + $0x4] sm:$0xf]  ;;  %v1493_v44 = vld [vmem:[%s1638_s3] sm:$0xf] }
  0x86   : > { %v660_v14 = vsel %vm653_vm1, %v658_v9, 0.0  ;;  %v665_v15 = vsel %vm661_vm2, %v663_v10, 0.0  ;;  %v670_v16 = vsel %vm636_vm0, %v669_v7, %v668_v6  ;;  %995 = vlog2.f32 %v330_v8  ;;  %s897_s30 = sshll.u32 %s1205_s21, 7  ;;  %s321_s13 = scalar_lea.vmem [#allocation10], %s1456_s7 }
  0x87   : > { %v666_v17 = vadd.f32 %v665_v15, %v660_v14  ;;  %v672_v18 = vsel %vm667_vm3, %v670_v16, 0.0  ;;  %v677_v19 = vsel %vm636_vm0, %v676_v12, %v675_v11  ;;  %v340_v20 = vsub.f32 1.0, %v330_v8  ;;  %s733_s17 = sshll.u32 %s321_s13, 4  ;;  %s1552_s2 = scalar_lea.hbm %s1640_s5, %s897_s30  ;;  %s1554_s17 = int_to_ptr.vmem [resolvable:$true] %s733_s17 }
  0x88   : > { %v679_v21 = vsel %vm674_vm4, %v677_v19, 0.0  ;;  %997 = vlog2.f32 %v329_v13  ;;  %v339_v22 = vsub.f32 1.0, %v329_v13  ;;  %v1222_v24 = vmov 1966171168   ;;  %s707_s14 = scalar_lea.sflag [#allocation11], %s1453_s20  ;;  %s1091_s9 = scalar_lea.vmem %s1554_s17, 128 }
  0x89   : > { %v673_v23 = vadd.f32 %v672_v18, %v666_v17  ;;  %999 = vlog2.f32 %v340_v20  ;;  %v350_v25 = vunpack.c.l.s4 %v1222_v24  ;;  %v681_v27 = vld [vmem:[#allocation2] sm:$0x3]  ;;  %v1479_v31 = vshrl.u32 %v352_v26, 7  ;;  %p1092_p3 = scmp.ne.s32.totalorder %s1554_s17, %s1091_s9  ;;  %p1676_p7 = scmp.ne.s32.totalorder %s1656_s29, 0 }
  0x8a   : > { %1001 = vlog2.f32 %v339_v22  ;;  %vm688_vm5 = vcmask 1041408   ;;  %v1496_v53 = vsub.f32 1.0, %v1485_v40  ;;  %v1499_v55 = vsub.f32 1.0, %v1493_v44  ;;  %s1223_s25 = smov [#allocation10]  }
  0x8b   : > { %v680_v28 = vadd.f32 %v679_v21, %v673_v23  ;;  %v351_v30 = vunpack.c.0.s8 %v350_v25  ;;  %v1488_v43 = vsub.s32 0, %v1479_v31  ;;  %vm561_vm6 = vcmask 60416   ;;  %p1093_p8 = pnand %p1092_p3, %p1676_p7  ;;  %s1095_s15 = sshll.u32 %s1223_s25, 4  ;;  %s1096_s15 = int_to_ptr.vmem [resolvable:$false] %s1095_s15 }
  0x8c   : > { %vm638_vm7 = vcmask 1042434   ;;  %vm640_vm8 = vcmask 1043459   ;;  %vm647_vm9 = vcmask 27648   ;;  %s1097_s8 = scalar_lea.vmem %s1096_s15, 256  ;;  %p1098_p4 = scmp.lt.s32.totalorder %s1554_s17, %s1096_s15 }
  0x8d   : > { %v682_v29 = vadd.f32 %v681_v27, %v680_v28  ;;  %v354_v34 = vsub.s32 %v351_v30, %v1479_v31  ;;  %p1094_p0 = pneg %p1093_p8  ;;  %p1099_p6 = scmp.lt.s32.totalorder %s1097_s8, %s1091_s9 }
  0x8f   : > { %683 = vst [vmem:[#allocation2] sm:$0x3] %v682_v29  ;;  %p1100_p2 = por %p1099_p6, %p1098_p4 }
  0x90   : > { %v996_v32 = vpop.eup %995 }
  0x91   : > { %v336_v33 = vmul.f32 0.6931472, %v996_v32  ;;  %p1101_p10 = pnand %p1100_p2, %p1094_p0 }
  0x92   : > { %v998_v35 = vpop.eup %997 }
  0x93   : > { %v1000_v36 = vpop.eup %999  ;;  %v338_v37 = vmax.f32 %v336_v33, -100.0  ;;  %v334_v38 = vmul.f32 0.6931472, %v998_v35 }
  0x94   : > { %v1002_v39 = vpop.eup %1001  ;;  %v344_v41 = vmul.f32 0.6931472, %v1000_v36 }
  0x95   : > { %v379_v42 = vrot.slane %v338_v37, %v354_v34  ;;  %v337_v45 = vmax.f32 %v334_v38, -100.0  ;;  %v342_v46 = vmul.f32 0.6931472, %v1002_v39 }
  0x96   : > { %v687_v47 = vld [vmem:[#allocation2] sm:$0x3]  ;;  %v346_v48 = vmax.f32 %v344_v41, -100.0 }
  0x97   : > { %v689_v49 = vsel %vm688_vm5, %v687_v47, 0.0  ;;  %v387_v50 = vrot.slane %v379_v42, %v354_v34  ;;  %v345_v51 = vmax.f32 %v342_v46, -100.0  ;;  %v355_v52 = vrot.slane %v337_v45, %v354_v34 }
  0x98   : > { %690 = vadd.xlane.f32.xlu0 %v689_v49  ;;  %v479_v54 = vrot.slane %v346_v48, %v354_v34  ;;  %v380_v56 = vcombine.high %v379_v42, %v379_v42 }
  0x99   : > { %v416_v57 = vrot.slane %v387_v50, %v1488_v43  ;;  %v363_v58 = vrot.slane %v355_v52, %v354_v34  ;;  %v455_v59 = vrot.slane %v345_v51, %v354_v34  ;;  %v356_v60 = vcombine.high %v355_v52, %v355_v52 }
  0x9a   : > { %v487_v61 = vrot.slane %v479_v54, %v354_v34  ;;  %v394_v62 = vrot.slane %v380_v56, %v354_v34  ;;  %v480_v63 = vcombine.high %v479_v54, %v479_v54  ;;  %v395_v0 = vcombine.high %v387_v50, %v387_v50 }
  0x9b   : > { %v441_v1 = vmul.f32 %v416_v57, %v1485_v40  ;;  %v400_v2 = vrot.slane %v363_v58, %v1488_v43  ;;  %v463_v3 = vrot.slane %v455_v59, %v354_v34  ;;  %v370_v4 = vrot.slane %v356_v60, %v354_v34 }
  0x9c   : > { %v516_v5 = vrot.slane %v487_v61, %v1488_v43  ;;  %v456_v6 = vcombine.high %v455_v59, %v455_v59  ;;  %v420_v7 = vrot.slane %v394_v62, %v1488_v43  ;;  %v494_v8 = vrot.slane %v480_v63, %v354_v34 }
  0x9d   : > { %v437_v9 = vmul.f32 %v400_v2, %v1493_v44  ;;  %v500_v10 = vrot.slane %v463_v3, %v1488_v43  ;;  %v404_v11 = vrot.slane %v370_v4, %v1488_v43  ;;  %v371_v12 = vcombine.high %v363_v58, %v363_v58 }
  0x9e   : > { %v541_v13 = vmul.f32 %v516_v5, %v1496_v53  ;;  %v470_v14 = vrot.slane %v456_v6, %v354_v34  ;;  %v442_v15 = vmul.f32 %v420_v7, %v1485_v40  ;;  %v520_v16 = vrot.slane %v494_v8, %v1488_v43 }
  0x9f   : > { %v537_v17 = vmul.f32 %v500_v10, %v1499_v55  ;;  %v438_v18 = vmul.f32 %v404_v11, %v1493_v44  ;;  %v408_v19 = vrot.slane %v371_v12, %v1488_v43  ;;  %v471_v20 = vcombine.high %v463_v3, %v463_v3 }
  0xa0   : > { %v549_v21 = vadd.f32 %v541_v13, %v441_v1  ;;  %v504_v22 = vrot.slane %v470_v14, %v1488_v43  ;;  %v542_v23 = vmul.f32 %v520_v16, %v1496_v53  ;;  %v424_v24 = vrot.slane %v395_v0, %v1488_v43 }
  0xa1   : > { %v545_v25 = vadd.f32 %v537_v17, %v437_v9  ;;  %v439_v27 = vmul.f32 %v408_v19, %v1493_v44  ;;  %v508_v28 = vrot.slane %v471_v20, %v1488_v43  ;;  %v495_v29 = vcombine.high %v487_v61, %v487_v61 }
  0xa2   : > { %v557_v30 = vsub.f32 0.0, %v549_v21  ;;  %v538_v32 = vmul.f32 %v504_v22, %v1499_v55  ;;  %v550_v33 = vadd.f32 %v542_v23, %v442_v15  ;;  %v443_v34 = vmul.f32 %v424_v24, %v1485_v40 }
  0xa3   : > { %v553_v35 = vsub.f32 0.0, %v545_v25  ;;  %v539_v36 = vmul.f32 %v508_v28, %v1499_v55  ;;  %v524_v37 = vrot.slane %v495_v29, %v1488_v43  ;;  %v372_v38 = vcombine.high %v370_v4, %v370_v4 }
  0xa4   : > { %v574_v39 = vsel %vm561_vm6, %v557_v30, 0.0  ;;  %v546_v41 = vadd.f32 %v538_v32, %v438_v18  ;;  %v558_v42 = vsub.f32 0.0, %v550_v33  ;;  %v472_v45 = vcombine.high %v470_v14, %v470_v14 }
  0xa5   : > { %575 = vadd.xlane.f32.xlu1 %v574_v39  ;;  %v562_v46 = vsel %vm561_vm6, %v553_v35, 0.0  ;;  %v547_v47 = vadd.f32 %v539_v36, %v439_v27  ;;  %v543_v48 = vmul.f32 %v524_v37, %v1496_v53  ;;  %v412_v49 = vrot.slane %v372_v38, %v1488_v43 }
  0xa6   : > { %563 = vadd.xlane.f32.xlu0 %v562_v46  ;;  %v554_v50 = vsub.f32 0.0, %v546_v41  ;;  %v577_v51 = vsel %vm561_vm6, %v558_v42, 0.0  ;;  %v512_v52 = vrot.slane %v472_v45, %v1488_v43  ;;  %v396_v54 = vcombine.high %v394_v62, %v394_v62 }
  0xa7   : > { %v555_v56 = vsub.f32 0.0, %v547_v47  ;;  %v551_v57 = vadd.f32 %v543_v48, %v443_v34  ;;  %v440_v58 = vmul.f32 %v412_v49, %v1493_v44  ;;  %v496_v59 = vcombine.high %v494_v8, %v494_v8 }
  0xa8   : > { %v565_v60 = vsel %vm561_vm6, %v554_v50, 0.0  ;;  %v540_v61 = vmul.f32 %v512_v52, %v1499_v55  ;;  %v428_v63 = vrot.slane %v396_v54, %v1488_v43  ;;  %v603_v8 = vand.u32 127, %v352_v26 }
  0xa9   : > { %566 = vadd.xlane.f32.xlu1 %v565_v60  ;;  %v559_v0 = vsub.f32 0.0, %v551_v57  ;;  %v528_v1 = vrot.slane %v496_v59, %v1488_v43  ;;  %v568_v2 = vsel %vm561_vm6, %v555_v56, 0.0 }
  0xaa   : > { %578 = vadd.xlane.f32.xlu0 %v577_v51  ;;  %v548_v3 = vadd.f32 %v540_v61, %v440_v58  ;;  %v444_v62 = vmul.f32 %v428_v63, %v1485_v40  ;;  %v606_v9 = vsub.s32 %v603_v8, %v1479_v31 }
  0xab   : > { %v580_v4 = vsel %vm561_vm6, %v559_v0, 0.0  ;;  %v544_v44 = vmul.f32 %v528_v1, %v1496_v53 }
  0xac   : > { %v556_v5 = vsub.f32 0.0, %v548_v3 }
  0xad   : > { %569 = vadd.xlane.f32.xlu1 %v568_v2  ;;  %v552_v6 = vadd.f32 %v544_v44, %v444_v62 }
  0xae   : > { %581 = vadd.xlane.f32.xlu0 %v580_v4  ;;  %v571_v55 = vsel %vm561_vm6, %v556_v5, 0.0 }
  0xaf   : > { %v560_v7 = vsub.f32 0.0, %v552_v6 }
  0xb1   : > { %572 = vadd.xlane.f32.xlu1 %v571_v55  ;;  %v583_v43 = vsel %vm561_vm6, %v560_v7, 0.0 }
  0xb2   : > { %584 = vadd.xlane.f32.xlu0 %v583_v43 }
 0x125   : > { %v691_v40 = vpop.xlane.xlu0 %690 }
 0x126   : > { %v692_v10 = vrot.slane %v691_v40, 4 }
 0x128   : > { %v693_v11 = vadd.f32 %v692_v10, %v691_v40 }
 0x12a   : > { %v694_v12 = vrot.slane %v693_v11, 2 }
 0x12c   : > { %v695_v53 = vadd.f32 %v694_v12, %v693_v11 }
 0x12e   : > { %v696_v13 = vrot.slane %v695_v53, 1 }
 0x130   : > { %v697_v14 = vadd.f32 %v696_v13, %v695_v53 }
 0x132   : > { %903 = vpush %v697_v14  ;;  %v576_v15 = vpop.xlane.xlu1 %575 }
 0x133   : > { %v564_v16 = vpop.xlane.xlu0 %563  ;;  %v590_v18 = vmul.f32 0.125, %v576_v15 }
 0x134   : > { %v586_v17 = vmul.f32 0.125, %v564_v16 }
 0x135   : > { %v623_v31 = vrot.slane %v590_v18, %v606_v9 }
 0x136   : > { %v567_v19 = vpop.xlane.xlu1 %566  ;;  %v607_v26 = vrot.slane %v586_v17, %v606_v9 }
 0x137   : > { %v587_v20 = vmul.f32 0.125, %v567_v19  ;;  %v579_v21 = vpop.xlane.xlu0 %578 }
 0x138   : > { %v591_v22 = vmul.f32 0.125, %v579_v21 }
 0x139   : > { %v611_v23 = vrot.slane %v587_v20, %v606_v9 }
 0x13a   : > { %v627_v24 = vrot.slane %v591_v22, %v606_v9  ;;  %v570_v25 = vpop.xlane.xlu1 %569 }
 0x13b   : > { %v588_v27 = vmul.f32 0.125, %v570_v25  ;;  %v582_v28 = vpop.xlane.xlu0 %581  ;;  %v637_v30 = vsel %vm636_vm0, %v611_v23, %v607_v26 }
 0x13c   : > { %v592_v29 = vmul.f32 0.125, %v582_v28  ;;  %v642_v33 = vsel %vm636_vm0, %v627_v24, %v623_v31 }
 0x13d   : > { %v615_v32 = vrot.slane %v588_v27, %v606_v9 }
 0x13e   : > { %v631_v34 = vrot.slane %v592_v29, %v606_v9  ;;  %v573_v35 = vpop.xlane.xlu1 %572 }
 0x13f   : > { %v589_v36 = vmul.f32 0.125, %v573_v35  ;;  %v585_v37 = vpop.xlane.xlu0 %584  ;;  %v639_v38 = vsel %vm638_vm7, %v615_v32, %v637_v30 }
 0x140   : > { %v593_v39 = vmul.f32 0.125, %v585_v37  ;;  %v643_v41 = vsel %vm638_vm7, %v631_v34, %v642_v33 }
 0x141   : > { %v619_v42 = vrot.slane %v589_v36, %v606_v9 }
 0x142   : > { %v635_v45 = vrot.slane %v593_v39, %v606_v9 }
 0x143   : > { %v641_v46 = vsel %vm640_vm8, %v619_v42, %v639_v38 }
 0x144   : > { %648 = vst.msk [vmem:[%s321_s13] sm:$0xf] %vm647_vm9, %v641_v46  ;;  %v644_v47 = vsel %vm640_vm8, %v635_v45, %v643_v41 }
 0x145   : > { %649 = vst.msk [vmem:[%s321_s13 + $0x4] sm:$0xf] %vm647_vm9, %v644_v47 }
 0x146   : > { %1104 = shalt.err (!%p1101_p10)
}
 0x147   : > { %s1105_s6 = scalar_lea.hbm %s1552_s2, 128  ;;  %s1109_s16 = scalar_lea.hbm %s1640_s5, 256 }
 0x148   : > { %p1106_p5 = scmp.ne.s32.totalorder %s1552_s2, %s1105_s6  ;;  %p1110_p12 = scmp.lt.u32.totalorder %s1552_s2, %s1640_s5 }
 0x149   : > { %p1111_p9 = scmp.lt.u32.totalorder %s1109_s16, %s1105_s6  ;;  %p1113_p3 = scmp.lt.u32.totalorder %s1105_s6, %s1552_s2 }
 0x14a   : > { %p1107_p13 = pnand %p1106_p5, %p1676_p7 }
 0x14b   : > { %p1112_p1 = por %p1111_p9, %p1110_p12 }
 0x14c   : > { %p1108_p11 = pneg %p1107_p13 }
 0x14d   : > { %p1114_p8 = por %p1113_p3, %p1112_p1 }
 0x14f   : > { %p1115_p0 = pnand %p1114_p8, %p1108_p11 }
 0x151   : > { %1118 = shalt.err (!%p1115_p0)
}
 0x152   : > { %s1224_s26 = smov 64   ;;  %s1225_s27 = smov 4  }
 0x153   : > { %914 = dma.vmem_to_hbm [thread:$0]  (%p1676_p7), %s1554_s17, 128, %s1552_s2, %s707_s14, %s1224_s26, %s1224_s26, %s1225_s27  }
 0x154   : > { %s314_s13 = scalar_lea.vmem [#allocation9], %s1456_s7  ;;  %s1588_s15 = scalar_lea.hbm %s1639_s4, %s897_s30 }
 0x155   : > { %s720_s12 = sshll.u32 %s314_s13, 4  ;;  %s702_s8 = scalar_lea.sflag [#allocation5], %s1453_s20  ;;  %s1581_s12 = int_to_ptr.vmem [resolvable:$true] %s720_s12 }
 0x156   : > { %s1119_s6 = scalar_lea.vmem %s1581_s12, 128  ;;  %s1226_s7 = smov [#allocation9]  }
 0x157   : > { %p1120_p4 = scmp.ne.s32.totalorder %s1581_s12, %s1119_s6  ;;  %s1123_s17 = sshll.u32 %s1226_s7, 4  ;;  %s1124_s17 = int_to_ptr.vmem [resolvable:$false] %s1123_s17 }
 0x158   : > { %s1125_s2 = scalar_lea.vmem %s1124_s17, 256  ;;  %p1126_p10 = scmp.lt.s32.totalorder %s1581_s12, %s1124_s17 }
 0x159   : > { %p1121_p6 = pnand %p1120_p4, %p1676_p7  ;;  %p1127_p5 = scmp.lt.s32.totalorder %s1125_s2, %s1119_s6 }
 0x15b   : > { %p1122_p2 = pneg %p1121_p6  ;;  %p1128_p13 = por %p1127_p5, %p1126_p10 }
 0x15d   : > { %p1129_p11 = pnand %p1128_p13, %p1122_p2 }
 0x163   : > { %s904_s0 = spop %903 }
 0x164   : > { %v699_v48 = vstv %s904_s0 }
 0x165   : > { %700 = vst [vmem:[%s314_s13] sm:$0xff] %v699_v48 }
 0x166   : > { %1132 = shalt.err (!%p1129_p11)
}
 0x167   : > { %s1133_s21 = scalar_lea.hbm %s1588_s15, 128  ;;  %s1137_s14 = scalar_lea.hbm %s1639_s4, 256 }
 0x168   : > { %p1134_p12 = scmp.ne.s32.totalorder %s1588_s15, %s1133_s21  ;;  %p1138_p3 = scmp.lt.u32.totalorder %s1588_s15, %s1639_s4 }
 0x169   : > { %p1139_p8 = scmp.lt.u32.totalorder %s1137_s14, %s1133_s21  ;;  %p1141_p4 = scmp.lt.u32.totalorder %s1133_s21, %s1588_s15 }
 0x16a   : > { %p1135_p9 = pnand %p1134_p12, %p1676_p7 }
 0x16b   : > { %p1140_p0 = por %p1139_p8, %p1138_p3 }
 0x16c   : > { %p1136_p1 = pneg %p1135_p9 }
 0x16d   : > { %p1142_p6 = por %p1141_p4, %p1140_p0 }
 0x16f   : > { %p1143_p2 = pnand %p1142_p6, %p1136_p1 }
 0x171   : > { %1146 = shalt.err (!%p1143_p2)
}
 0x172   : > { %913 = dma.vmem_to_hbm [thread:$0]  (%p1676_p7), %s1581_s12, 128, %s1588_s15, %s702_s8  }
 0x173 PF: > { %s1677_s16 = sld [smem:[#allocation18_spill]]  ;;  %s748_s24 = sand.u32 1, %s1193_s18  }
 0x174   : > { %p1679_p5 = scmp.ge.s32.totalorder %s1213_s23, 2  ;;  %s749_s28 = scalar_lea.sflag [#allocation5], %s748_s24 }
 0x179   : > { %p1678_p10 = scmp.ne.s32.totalorder %s1677_s16, 0 }
 0x17b   : > { %p929_p13 = pnand %p1679_p5, %p1678_p10 }
 0x17d   : > { %1184 = dma.done.wait (!%p929_p13), %s749_s28, 128  }
 0x17e   : > { %1186 = vsyncadd (!%p929_p13), %s749_s28, 4294967168  ;;  %s758_s26 = scalar_lea.sflag [#allocation11], %s748_s24 }
 0x17f   : > { %1188 = dma.done.wait (!%p929_p13), %s758_s26, 128  }
 0x180   : > { %1190 = vsyncadd (!%p929_p13), %s758_s26, 4294967168  ;;  %s28_s23 = sadd.s32 1, %s1213_s23   ;;  %s1680_s29 = sld [smem:[#allocation17_spill]] }
 0x181   : > { %p25_p11 = scmp.ge.s32.totalorder %s28_s23, 4   ;;  %s1681_s20 = sld [smem:[#allocation20_spill]] }
 0x182   : > { %s1682_s27 = sld [smem:[#allocation19_spill]]  ;;  %s1683_s18 = smov %s1197_s19 }
 0x183   : > { %s1685_s21 = smov %s1209_s22  ;;  %27 = sbr.rel (!%p25_p11) target bundleno = 13 (0xd), region = 123 }
 0x186   : > { %s1684_s19 = smov %s1680_s29 }
 0x188   : > { %s1686_s22 = smov %s1682_s27 }
 0x18a   :  { %763 = vsyncpa [#allocation4], 1 }
 0x18b   :  { %765 = vsyncpa [#allocation4 + $0x1], 1 }
 0x18c   :  { %766 = vsyncpa [#allocation7], 1 }
 0x18d   :  { %768 = vsyncpa [#allocation7 + $0x1], 1 }
 0x18e   :  { %769 = vsyncpa [#allocation5], 1 }
 0x18f   :  { %771 = vsyncpa [#allocation5 + $0x1], 1 }
 0x190   :  { %772 = vsyncpa [#allocation11], 1 }
 0x191   :  { %774 = vsyncpa [#allocation11 + $0x1], 1 }

</bundles_post_ra>
